<compile_context>
chip_gen: v6e
topology: v6e:2x2x1
jax: 0.10.0
libtpu: 0.0.40
codegen_flags: <defaults>
</compile_context>

<pallas_src>
import functools

import jax
import jax.numpy as jnp
from jax.experimental import pallas as pl
from jax.experimental.pallas import tpu as pltpu


def _my_loss_kernel(x_ref, y_ref, yd_ref, out_ref, acc_ref, *, inv_n):
    """One row-block per grid step; partial sums live in SMEM scratch."""
    i = pl.program_id(0)

    @pl.when(i == 0)
    def _init():
        acc_ref[0] = jnp.float32(0.0)   # running sum of per-element BCE
        acc_ref[1] = jnp.float32(0.0)   # running sum of log(y_d)**2

    x = x_ref[...].astype(jnp.float32)
    y = y_ref[...].astype(jnp.float32)
    yd = yd_ref[...].astype(jnp.float32)

    # Numerically-stable binary_cross_entropy_with_logits (PyTorch's form):
    #   max(x, 0) - x*y + log1p(exp(-|x|))
    bce = jnp.maximum(x, 0.0) - x * y + jnp.log1p(jnp.exp(-jnp.abs(x)))
    acc_ref[0] += jnp.sum(bce)
    acc_ref[1] += jnp.sum(jnp.log(yd) ** 2)

    @pl.when(i == pl.num_programs(0) - 1)
    def _finalize():
        # Mean over the full element count, computed exactly once.
        out_ref[0] = acc_ref[0] * jnp.float32(inv_n) + jnp.float32(1e-6) * acc_ref[1]


def _pick_row_block(rows, max_rows):
    """Largest divisor of `rows` that is <= max_rows and a multiple of 8
    (or the full extent). Guarantees a legal TPU block with no padding."""
    if rows <= max_rows:
        return rows
    for cand in range(min(max_rows, rows), 0, -1):
        if rows % cand == 0 and cand % 8 == 0:
            return cand
    return rows  # fallback: single full-extent block


def my_loss(x, y, y_d, *, block_rows=512):
    """Pallas equivalent of My_loss.forward(x, y, y_d). Returns a scalar."""
    assert x.shape == y.shape == y_d.shape

    # Flatten to 2-D (rows, lanes): loss is elementwise + full reduction, so
    # only a lane-dense trailing dim matters for layout.
    if x.ndim == 1:
        x2, y2, yd2 = (t.reshape(1, -1) for t in (x, y, y_d))
    else:
        cols = x.shape[-1]
        lead = 1
        for d in x.shape[:-1]:
            lead *= d
        x2 = x.reshape(lead, cols)
        y2 = y.reshape(lead, cols)
        yd2 = y_d.reshape(lead, cols)

    rows, cols = x2.shape
    br = _pick_row_block(rows, block_rows)
    grid = (rows // br,)
    inv_n = 1.0 / float(rows * cols)

    kernel = functools.partial(_my_loss_kernel, inv_n=inv_n)

    out = pl.pallas_call(
        kernel,
        out_shape=jax.ShapeDtypeStruct((1,), jnp.float32),
        grid_spec=pltpu.PrefetchScalarGridSpec(
            num_scalar_prefetch=0,
            grid=grid,
            in_specs=[
                pl.BlockSpec((br, cols), lambda i: (i, 0)),
                pl.BlockSpec((br, cols), lambda i: (i, 0)),
                pl.BlockSpec((br, cols), lambda i: (i, 0)),
            ],
            # Scalar output lives in SMEM -> no masked (1,1) vector store, no
            # wasted (8,128) output tile DMA.
            out_specs=pl.BlockSpec(memory_space=pltpu.MemorySpace.SMEM),
            scratch_shapes=[pltpu.SMEM((2,), jnp.float32)],
        ),
        compiler_params=pltpu.CompilerParams(
            dimension_semantics=("arbitrary",),  # reduction axis
        ),
    )(x2, y2, yd2)
    return out[0]


def my_loss_ref(x, y, y_d):
    """Pure-JAX reference for correctness checking."""
    x = x.astype(jnp.float32)
    y = y.astype(jnp.float32)
    y_d = y_d.astype(jnp.float32)
    bce = jnp.maximum(x, 0.0) - x * y + jnp.log1p(jnp.exp(-jnp.abs(x)))
    return jnp.mean(bce) + 1e-6 * jnp.sum(jnp.log(y_d) ** 2)


if __name__ == "__main__":
    # --- small case consistent with the module (logits / targets / y_d) ----
    k1, k2, k3 = jax.random.split(jax.random.PRNGKey(0), 3)
    x = jax.random.normal(k1, (8, 128), dtype=jnp.float32)
    y = jax.random.uniform(k2, (8, 128), dtype=jnp.float32)          # soft targets in [0,1]
    y_d = jax.random.uniform(k3, (8, 128), dtype=jnp.float32,
                             minval=0.1, maxval=2.0)                 # strictly positive

    out = jax.block_until_ready(my_loss(x, y, y_d))
    ref = jax.block_until_ready(my_loss_ref(x, y, y_d))
    assert jnp.allclose(out, ref, rtol=1e-5, atol=1e-5), (out, ref)

    # --- larger case to exercise the gridded accumulator path --------------
    k4, k5, k6 = jax.random.split(jax.random.PRNGKey(1), 3)
    xb = jax.random.normal(k4, (1024, 256), dtype=jnp.float32)
    yb = jax.random.uniform(k5, (1024, 256), dtype=jnp.float32)
    ydb = jax.random.uniform(k6, (1024, 256), dtype=jnp.float32,
                             minval=0.1, maxval=2.0)

    out_b = jax.block_until_ready(my_loss(xb, yb, ydb))
    ref_b = jax.block_until_ready(my_loss_ref(xb, yb, ydb))
    assert jnp.allclose(out_b, ref_b, rtol=1e-4, atol=1e-5), (out_b, ref_b)

    print("KERNEL_OK")
</pallas_src>

<mosaic_0001>
module attributes {stable_mosaic.version = 11 : i64} {
  func.func @_my_loss_kernel(%arg0: i32, %arg1: memref<8x128xf32, #tpu.memory_space<vmem>>, %arg2: memref<8x128xf32, #tpu.memory_space<vmem>>, %arg3: memref<8x128xf32, #tpu.memory_space<vmem>>, %arg4: memref<1xf32, #tpu.memory_space<smem>>, %arg5: memref<2xf32, #tpu.memory_space<smem>>) attributes {dimension_semantics = [#tpu.dimension_semantics<arbitrary>], iteration_bounds = array<i64: 1>, scalar_prefetch = 0 : i64, scratch_operands = 1 : i64, tpu.core_type = #tpu.core_type<tc>, window_params = [{transform_indices = @transform_0, window_bounds = array<i64: 8, 128>}, {transform_indices = @transform_1, window_bounds = array<i64: 8, 128>}, {transform_indices = @transform_2, window_bounds = array<i64: 8, 128>}, {transform_indices = @transform_3, window_bounds = array<i64: 1>}]} {
    %c0_i32 = arith.constant 0 : i32
    %0 = arith.cmpi eq, %arg0, %c0_i32 : i32
    %1 = arith.extui %0 : i1 to i32
    %c0_i32_0 = arith.constant 0 : i32
    %2 = arith.cmpi ne, %1, %c0_i32_0 : i32
    scf.if %2 {
      %cst_14 = arith.constant 0.000000e+00 : f32
      %c0_15 = arith.constant 0 : index
      %35 = memref.load %arg5[%c0_15] : memref<2xf32, #tpu.memory_space<smem>>
      memref.store %cst_14, %arg5[%c0_15] : memref<2xf32, #tpu.memory_space<smem>>
      %cst_16 = arith.constant 0.000000e+00 : f32
      %c1_17 = arith.constant 1 : index
      %36 = memref.load %arg5[%c1_17] : memref<2xf32, #tpu.memory_space<smem>>
      memref.store %cst_16, %arg5[%c1_17] : memref<2xf32, #tpu.memory_space<smem>>
    } else {
    }
    %c0 = arith.constant 0 : index
    %c0_1 = arith.constant 0 : index
    %3 = vector.load %arg1[%c0, %c0_1] : memref<8x128xf32, #tpu.memory_space<vmem>>, vector<8x128xf32>
    %c0_2 = arith.constant 0 : index
    %c0_3 = arith.constant 0 : index
    %4 = vector.load %arg2[%c0_2, %c0_3] : memref<8x128xf32, #tpu.memory_space<vmem>>, vector<8x128xf32>
    %c0_4 = arith.constant 0 : index
    %c0_5 = arith.constant 0 : index
    %5 = vector.load %arg3[%c0_4, %c0_5] : memref<8x128xf32, #tpu.memory_space<vmem>>, vector<8x128xf32>
    %cst = arith.constant 0.000000e+00 : f32
    %6 = vector.broadcast %cst : f32 to vector<8x128xf32>
    %7 = arith.maximumf %3, %6 : vector<8x128xf32>
    %8 = arith.mulf %3, %4 : vector<8x128xf32>
    %9 = arith.subf %7, %8 : vector<8x128xf32>
    %10 = math.absf %3 : vector<8x128xf32>
    %cst_6 = arith.constant 0.000000e+00 : f32
    %11 = vector.broadcast %cst_6 : f32 to vector<8x128xf32>
    %12 = arith.subf %11, %10 : vector<8x128xf32>
    %13 = math.exp %12 : vector<8x128xf32>
    %14 = math.log1p %13 : vector<8x128xf32>
    %15 = arith.addf %9, %14 : vector<8x128xf32>
    %c0_7 = arith.constant 0 : index
    %16 = memref.load %arg5[%c0_7] : memref<2xf32, #tpu.memory_space<smem>>
    %17 = vector.shape_cast %15 : vector<8x128xf32> to vector<1x8x128xf32>
    %cst_8 = arith.constant dense<0.000000e+00> : vector<1xf32>
    %18 = vector.multi_reduction <add>, %17, %cst_8 [1, 2] : vector<1x8x128xf32> to vector<1xf32>
    %19 = vector.shape_cast %18 : vector<1xf32> to vector<1x1x1xf32>
    %20 = vector.extract %19[0, 0, 0] : f32 from vector<1x1x1xf32>
    %21 = arith.addf %16, %20 : f32
    %c0_9 = arith.constant 0 : index
    %22 = memref.load %arg5[%c0_9] : memref<2xf32, #tpu.memory_space<smem>>
    memref.store %21, %arg5[%c0_9] : memref<2xf32, #tpu.memory_space<smem>>
    %c1 = arith.constant 1 : index
    %23 = memref.load %arg5[%c1] : memref<2xf32, #tpu.memory_space<smem>>
    %24 = math.log %5 : vector<8x128xf32>
    %25 = arith.mulf %24, %24 : vector<8x128xf32>
    %26 = vector.shape_cast %25 : vector<8x128xf32> to vector<1x8x128xf32>
    %cst_10 = arith.constant dense<0.000000e+00> : vector<1xf32>
    %27 = vector.multi_reduction <add>, %26, %cst_10 [1, 2] : vector<1x8x128xf32> to vector<1xf32>
    %28 = vector.shape_cast %27 : vector<1xf32> to vector<1x1x1xf32>
    %29 = vector.extract %28[0, 0, 0] : f32 from vector<1x1x1xf32>
    %30 = arith.addf %23, %29 : f32
    %c1_11 = arith.constant 1 : index
    %31 = memref.load %arg5[%c1_11] : memref<2xf32, #tpu.memory_space<smem>>
    memref.store %30, %arg5[%c1_11] : memref<2xf32, #tpu.memory_space<smem>>
    %c0_i32_12 = arith.constant 0 : i32
    %32 = arith.cmpi eq, %arg0, %c0_i32_12 : i32
    %33 = arith.extui %32 : i1 to i32
    %c0_i32_13 = arith.constant 0 : i32
    %34 = arith.cmpi ne, %33, %c0_i32_13 : i32
    scf.if %34 {
      %c0_14 = arith.constant 0 : index
      %35 = memref.load %arg5[%c0_14] : memref<2xf32, #tpu.memory_space<smem>>
      %cst_15 = arith.constant 9.765625E-4 : f32
      %36 = arith.mulf %35, %cst_15 : f32
      %c1_16 = arith.constant 1 : index
      %37 = memref.load %arg5[%c1_16] : memref<2xf32, #tpu.memory_space<smem>>
      %cst_17 = arith.constant 9.99999997E-7 : f32
      %38 = arith.mulf %cst_17, %37 : f32
      %39 = arith.addf %36, %38 : f32
      %c0_18 = arith.constant 0 : index
      %40 = memref.load %arg4[%c0_18] : memref<1xf32, #tpu.memory_space<smem>>
      memref.store %39, %arg4[%c0_18] : memref<1xf32, #tpu.memory_space<smem>>
    } else {
    }
    return
  }
  func.func @transform_0(%arg0: i32) -> (i32, i32) {
    %c0_i32 = arith.constant 0 : i32
    %c0_i32_0 = arith.constant 0 : i32
    return %arg0, %c0_i32 : i32, i32
  }
  func.func @transform_1(%arg0: i32) -> (i32, i32) {
    %c0_i32 = arith.constant 0 : i32
    %c0_i32_0 = arith.constant 0 : i32
    return %arg0, %c0_i32 : i32, i32
  }
  func.func @transform_2(%arg0: i32) -> (i32, i32) {
    %c0_i32 = arith.constant 0 : i32
    %c0_i32_0 = arith.constant 0 : i32
    return %arg0, %c0_i32 : i32, i32
  }
  func.func @transform_3(%arg0: i32) -> i32 {
    %c0_i32 = arith.constant 0 : i32
    %c0_i32_0 = arith.constant 0 : i32
    return %c0_i32 : i32
  }
}

</mosaic_0001>

<bundles_post_ra>
// kernel: tpu_custom_call.1
= control target key start
LH: loop header
LB: loop body
LE: loop exit
PB: predicated region body
PF: predicated region fallthrough
CT: control target
= control target key end

     0   :  { %8 = vsyncpa [#allocation4], 0  ;;  %s258_s0 = inlined_call_operand.hbm [shape: f32[8,128], index: 0, kind: input, shape index: {}]   ;;  %s259_s1 = inlined_call_operand.hbm [shape: f32[8,128], index: 1, kind: input, shape index: {}]   ;;  %s260_s2 = inlined_call_operand.hbm [shape: f32[8,128], index: 2, kind: input, shape index: {}]   ;;  %s261_s3 = inlined_call_operand.hbm [shape: f32[1], index: 3, kind: output, shape index: {}]  }
   0x1   :  { %9 = vsyncpa [#allocation7], 0 }
   0x2   :  { %10 = vsyncpa [#allocation5], 0  ;;  %s222_s12 = smov [#allocation6]   ;;  %s223_s14 = smov [#allocation3]  }
   0x3   :  { %s27_s13 = sshll.u32 %s222_s12, 4  ;;  %s17_s15 = sshll.u32 %s223_s14, 4  ;;  %s28_s13 = int_to_ptr.vmem [resolvable:$true] %s27_s13  ;;  %s18_s15 = int_to_ptr.vmem [resolvable:$true] %s17_s15 }
   0x4   :  { %s156_s16 = scalar_lea.vmem %s28_s13, 128  ;;  %p161_p1 = scmp.lt.s32.totalorder %s28_s13, %s28_s13 }
   0x5   :  { %p157_p0 = scmp.ne.s32.totalorder %s28_s13, %s156_s16  ;;  %p162_p2 = scmp.lt.s32.totalorder %s156_s16, %s156_s16 }
   0x7   :  { %p163_p3 = por %p162_p2, %p161_p1 }
   0x9   :  { %p164_p4 = pnand %p163_p3, %p157_p0 }
   0xb   :  { %167 = shalt.err (!%p164_p4)
}
   0xc   :  { %30 = dma.hbm_to_vmem [thread:$0]  %s259_s1, 128, %s28_s13, [#allocation7]  }
   0xd   :  { %s176_s19 = scalar_lea.vmem %s18_s15, 128  ;;  %p181_p6 = scmp.lt.s32.totalorder %s18_s15, %s18_s15 }
   0xe   :  { %p177_p5 = scmp.ne.s32.totalorder %s18_s15, %s176_s19  ;;  %p182_p7 = scmp.lt.s32.totalorder %s176_s19, %s176_s19 }
  0x10   :  { %p183_p8 = por %p182_p7, %p181_p6 }
  0x12   :  { %p184_p9 = pnand %p183_p8, %p177_p5 }
  0x14   :  { %187 = shalt.err (!%p184_p9)
}
  0x15   :  { %20 = dma.hbm_to_vmem [thread:$0]  %s258_s0, 128, %s18_s15, [#allocation4]  }
  0x16   :  { %s224_s22 = smov [#allocation8]  }
  0x17   :  { %s37_s23 = sshll.u32 %s224_s22, 4  ;;  %s38_s23 = int_to_ptr.vmem [resolvable:$true] %s37_s23 }
  0x18   :  { %s196_s24 = scalar_lea.vmem %s38_s23, 128  ;;  %p201_p11 = scmp.lt.s32.totalorder %s38_s23, %s38_s23 }
  0x19   :  { %p197_p10 = scmp.ne.s32.totalorder %s38_s23, %s196_s24  ;;  %p202_p12 = scmp.lt.s32.totalorder %s196_s24, %s196_s24 }
  0x1b   :  { %p203_p13 = por %p202_p12, %p201_p11 }
  0x1d   :  { %p204_p0 = pnand %p203_p13, %p197_p10 }
  0x1f   :  { %207 = shalt.err (!%p204_p0)
}
  0x20   :  { %40 = dma.hbm_to_vmem [thread:$0]  %s260_s2, 128, %s38_s23, [#allocation7]  }
  0x21   :  { %216 = dma.done.wait [#allocation4], 128  }
  0x22   :  { %217 = vsyncadd [#allocation4], 4294967168 }
  0x23   :  { %218 = dma.done.wait [#allocation7], 256  }
  0x24   :  { %219 = vsyncadd [#allocation7], 4294967040  ;;  %v58_v0 = vld [vmem:[#allocation3] sm:$0xff]  ;;  %v60_v4 = vld [vmem:[#allocation8] sm:$0xff]  ;;  %s225_s29 = smov [#allocation9]  }
  0x25   :  { %v64_v1 = vand.u32 2147483647, %v58_v0  ;;  %v59_v8 = vld [vmem:[#allocation6] sm:$0xff]  ;;  %v61_v10 = vmax.f32 %v58_v0, 0.0 }
  0x26   :  { %v62_v11 = vmul.f32 %v59_v8, %v58_v0 }
  0x27   :  { %v65_v2 = vsub.f32 0.0, %v64_v1 }
  0x28   :  { %v63_v16 = vsub.f32 %v61_v10, %v62_v11 }
  0x29   :  { %v66_v3 = vmul.f32 1.442695, %v65_v2 }
  0x2b   :  { %142 = vpow2.f32 %v66_v3 }
  0x2c   :  { %144 = vlog2.f32 %v60_v4 }
  0x38   :  { %v143_v5 = vpop.eup %142 }
  0x39   :  { %v68_v6 = vadd.f32 1.0, %v143_v5  ;;  %v71_v7 = vmul.f32 -0.5, %v143_v5  ;;  %v74_v12 = vand.u32 2147483647, %v143_v5  ;;  %v145_v13 = vpop.eup %144 }
  0x3a   :  { %v93_v18 = vmul.f32 0.6931472, %v145_v13 }
  0x3b   :  { %146 = vlog2.f32 %v68_v6  ;;  %v72_v9 = vadd.f32 1.0, %v71_v7  ;;  %vm75_vm0 = vcmp.lt.f32.partialorder %v74_v12, 0.0004427343 }
  0x3c   :  { %v94_v21 = vmul.f32 %v93_v18, %v93_v18 }
  0x3d   :  { %v73_v14 = vmul.f32 %v143_v5, %v72_v9 }
  0x48   :  { %v147_v15 = vpop.eup %146 }
  0x49   :  { %v70_v17 = vmul.f32 0.6931472, %v147_v15 }
  0x4b   :  { %v76_v19 = vsel %vm75_vm0, %v73_v14, %v70_v17 }
  0x4c   :  { %v77_v20 = vadd.f32 %v76_v19, %v63_v16 }
  0x4e   :  { %79 = vadd.xlane.f32.xlu0 %v77_v20 }
  0x52   :  { %95 = vadd.xlane.f32.xlu0 %v94_v21 }
  0xd7   :  { %v80_v22 = vpop.xlane.xlu0 %79 }
  0xd8   :  { %v81_v23 = vrot.slane %v80_v22, 4 }
  0xda   :  { %v82_v24 = vadd.f32 %v81_v23, %v80_v22 }
  0xdb   :  { %v96_v25 = vpop.xlane.xlu0 %95 }
  0xdc   :  { %v83_v26 = vrot.slane %v82_v24, 2  ;;  %v97_v27 = vrot.slane %v96_v25, 4 }
  0xde   :  { %v98_v28 = vadd.f32 %v97_v27, %v96_v25  ;;  %v84_v29 = vadd.f32 %v83_v26, %v82_v24 }
  0xe0   :  { %v99_v30 = vrot.slane %v98_v28, 2  ;;  %v85_v31 = vrot.slane %v84_v29, 1 }
  0xe2   :  { %v100_v32 = vadd.f32 %v99_v30, %v98_v28  ;;  %v86_v33 = vadd.f32 %v85_v31, %v84_v29 }
  0xe4   :  { %134 = vpush %v86_v33  ;;  %v101_v34 = vrot.slane %v100_v32, 1 }
  0xe6   :  { %v102_v35 = vadd.f32 %v101_v34, %v100_v32 }
  0xe8   :  { %136 = vpush %v102_v35 }
 0x115   :  { %s135_s0 = spop %134 }
 0x116   :  { %s111_s2 = smul.f32 0.0009765625, %s135_s0 }
 0x119   :  { %s137_s26 = spop %136 }
 0x11a   :  { %s113_s27 = smul.f32 1e-06, %s137_s26 }
 0x11c   :  { %s114_s28 = sadd.f32 %s113_s27, %s111_s2 }
 0x11e   :  { %116 = sst [smem:[#allocation9]] %s114_s28 }
 0x11f   :  { %124 = dma.smem_to_hbm %s225_s29, 16, %s261_s3, [#allocation5]  }
 0x120   :  { %220 = dma.done.wait [#allocation5], 16  }
 0x121   :  { %221 = vsyncadd [#allocation5], 4294967280 }
 0x122   :  { %128 = sfence }
 0x123   :  { %129 = vsyncpa [#allocation4], 1 }
 0x124   :  { %130 = vsyncpa [#allocation7], 1 }
 0x125   :  { %131 = vsyncpa [#allocation5], 1 }

</bundles_post_ra>
